<compile_context>
chip_gen: v7x
topology: tpu7x:2x2x1
jax: 0.10.0
libtpu: 0.0.40
codegen_flags: <defaults>
</compile_context>

<pallas_src>
import functools

import jax
import jax.numpy as jnp
from jax import lax
from jax.experimental import pallas as pl
from jax.experimental.pallas import tpu as pltpu

LATENT_DIM = 32
HIDDEN_SIZES = (64, 64)
LEAKY_SLOPE = 0.01           # torch.nn.LeakyReLU default negative_slope
MAX_BATCH_TILE = 4096        # rows per grid step; sweep 2048-8192 if desired
SMALL_BATCH_SINGLE_TILE = 512  # below this, one grid step (overhead dominates)


def _round_up(x, m):
    return ((x + m - 1) // m) * m


def _choose_batch_tile(batch, max_tile):
    """Pick the per-step batch tile.

    - batch <= 512: one (possibly partial) block, sublane dim rounded to 8.
    - 512 < batch <= max_tile: split into >=2 parallel steps (v7x megacore),
      tile rounded to 256 so the lane-dense (1, TB) output block stays legal.
    - batch > max_tile: use max_tile (already >=2 steps).
    """
    if batch <= SMALL_BATCH_SINGLE_TILE:
        return _round_up(max(batch, 1), 8)
    if batch <= max_tile:
        half = (batch + 1) // 2
        return max(256, min(max_tile, _round_up(half, 256)))
    return max_tile


def _critic_kernel(obs_ref, w1_ref, w2_ref, consts_ref, out_ref):
    """One batch tile, feature-major: activations are (H, TB), batch on lanes."""
    x = obs_ref[...].astype(jnp.bfloat16)                      # (TB, D)

    c = consts_ref[...]                                        # (H, 4) f32
    b1 = c[:, 0:1]                                             # (H1, 1)
    b2 = c[:, 1:2]                                             # (H2, 1)
    w3 = c[:, 2:3]                                             # (H2, 1)
    b3 = c[0:1, 3:4]                                           # (1, 1)

    # h1^T = W1 @ x^T : contract the last dims of both operands (QK^T pattern;
    # avoids materializing a transpose of the streamed obs tile).
    h1 = lax.dot_general(w1_ref[...], x,
                         dimension_numbers=(((1,), (1,)), ((), ())),
                         preferred_element_type=jnp.float32)   # (H1, TB) f32
    # bf16 tanh: halves the critical EUP work on v6e/v7x and feeds the next
    # MXU matmul directly (no separate cast).
    h1 = jnp.tanh((h1 + b1).astype(jnp.bfloat16))              # (H1, TB) bf16

    h2 = jnp.dot(w2_ref[...], h1,
                 preferred_element_type=jnp.float32)           # (H2, TB) f32
    h2 = jnp.tanh((h2 + b2).astype(jnp.bfloat16))              # (H2, TB) bf16

    # Final Linear(64 -> 1): VPU multiply + sublane (XLU) reduction; result is
    # already lane-dense, no 1-wide matmul through the MXU result path.
    v = jnp.sum(h2.astype(jnp.float32) * w3, axis=0, keepdims=True) + b3  # (1,TB)

    # output_activation = LeakyReLU(negative_slope=0.01)
    out_ref[...] = jnp.where(v >= 0.0, v, LEAKY_SLOPE * v)


@functools.partial(jax.jit, static_argnames=("max_batch_tile",))
def mlp_critic_forward(obs, w1, w2, consts, max_batch_tile=MAX_BATCH_TILE):
    """obs: [B, latent] f32 -> value: [B] f32 (== torch.squeeze(v_net(obs), -1)).

    w1 [H1, D] bf16, w2 [H2, H1] bf16 (PyTorch-native [out, in]);
    consts [H, 4] f32 packs (b1, b2, w3 column, b3-broadcast) as columns.
    """
    B, D = obs.shape
    H1 = w1.shape[0]
    H2 = w2.shape[0]
    assert consts.shape == (H2, 4)
    assert max_batch_tile % 128 == 0  # keeps multi-step lane-dense output legal

    TB = _choose_batch_tile(B, max_batch_tile)
    G = pl.cdiv(B, TB)   # no jnp.pad: the last obs block may be partial

    out = pl.pallas_call(
        _critic_kernel,
        out_shape=jax.ShapeDtypeStruct((1, G * TB), jnp.float32),
        grid_spec=pltpu.PrefetchScalarGridSpec(
            num_scalar_prefetch=0,
            grid=(G,),
            in_specs=[
                pl.BlockSpec((TB, D), lambda i: (i, 0)),      # obs tile
                pl.BlockSpec((H1, D), lambda i: (0, 0)),      # w1 (resident)
                pl.BlockSpec((H2, H1), lambda i: (0, 0)),     # w2 (resident)
                pl.BlockSpec((H2, 4), lambda i: (0, 0)),      # packed b1/b2/w3/b3
            ],
            # Lane-dense output: one (1, TB) slab per grid step.
            out_specs=pl.BlockSpec((1, TB), lambda i: (0, i)),
        ),
        compiler_params=pltpu.CompilerParams(
            dimension_semantics=("parallel",)),
    )(obs, w1, w2, consts)

    # torch.squeeze(v_net(obs), -1); drop garbage lanes past B (partial tile).
    return out[0, :B]


def init_params(key, latent_dim=LATENT_DIM, hidden_sizes=HIDDEN_SIZES):
    """Synthetic parameters with nn.Linear shapes/init: W [out, in], b [out]."""
    sizes = [latent_dim] + list(hidden_sizes) + [1]
    params = []
    for j in range(len(sizes) - 1):
        key, kw, kb = jax.random.split(key, 3)
        fan_in, fan_out = sizes[j], sizes[j + 1]
        bound = 1.0 / float(fan_in) ** 0.5
        w = jax.random.uniform(kw, (fan_out, fan_in), jnp.float32, -bound, bound)
        b = jax.random.uniform(kb, (fan_out,), jnp.float32, -bound, bound)
        params.append((w, b))
    return params


def pack_kernel_params(params):
    """Kernel-side layout: bf16 matmul weights + one packed f32 constants array.

    consts[:, 0] = b1, consts[:, 1] = b2, consts[:, 2] = w3 column,
    consts[:, 3] = b3 (broadcast; kernel reads element [0, 3]).
    """
    (w1, b1), (w2, b2), (w3, b3) = params
    H1, H2 = w1.shape[0], w2.shape[0]
    assert H1 == H2, "packed-constants layout assumes equal hidden sizes"
    consts = jnp.stack(
        [b1.astype(jnp.float32),
         b2.astype(jnp.float32),
         w3.reshape(-1).astype(jnp.float32),
         jnp.full((H2,), b3.reshape(()), jnp.float32)],
        axis=1)                                                # (H, 4)
    return (w1.astype(jnp.bfloat16), w2.astype(jnp.bfloat16), consts)


def _reference_forward(obs, params):
    """Pure-JAX f32 reference mirroring the PyTorch module."""
    (w1, b1), (w2, b2), (w3, b3) = params
    x = jnp.tanh(obs @ w1.T + b1)
    x = jnp.tanh(x @ w2.T + b2)
    v = x @ w3.T + b3
    v = jnp.where(v >= 0.0, v, LEAKY_SLOPE * v)
    return jnp.squeeze(v, -1)


if __name__ == "__main__":
    key = jax.random.PRNGKey(0)
    k_obs, k_obs2, k_obs3, k_params = jax.random.split(key, 4)

    params = init_params(k_params)
    kparams = pack_kernel_params(params)

    # Primary small check (batch=2): single partial block, default tile.
    obs = jax.random.normal(k_obs, (2, LATENT_DIM), jnp.float32)
    value = jax.block_until_ready(mlp_critic_forward(obs, *kparams))
    ref = _reference_forward(obs, params)
    assert value.shape == (2,)
    assert jnp.allclose(value, ref, atol=3e-2, rtol=1e-2), (
        float(jnp.max(jnp.abs(value - ref))))

    # Multi-step grid with a partial last tile (small max tile just for test).
    obs2 = jax.random.normal(k_obs2, (300, LATENT_DIM), jnp.float32)
    value2 = jax.block_until_ready(
        mlp_critic_forward(obs2, *kparams, max_batch_tile=128))
    ref2 = _reference_forward(obs2, params)
    assert value2.shape == (300,)
    assert jnp.allclose(value2, ref2, atol=3e-2, rtol=1e-2), (
        float(jnp.max(jnp.abs(value2 - ref2))))

    # Mid-size batch: exercises the >=2 parallel-step split (v7x megacore path).
    obs3 = jax.random.normal(k_obs3, (700, LATENT_DIM), jnp.float32)
    value3 = jax.block_until_ready(mlp_critic_forward(obs3, *kparams))
    ref3 = _reference_forward(obs3, params)
    assert value3.shape == (700,)
    assert jnp.allclose(value3, ref3, atol=3e-2, rtol=1e-2), (
        float(jnp.max(jnp.abs(value3 - ref3))))

    print("KERNEL_OK")
</pallas_src>

<mosaic_0001>
module attributes {stable_mosaic.version = 11 : i64} {
  func.func @_critic_kernel(%arg0: i32, %arg1: memref<8x32xf32, #tpu.memory_space<vmem>>, %arg2: memref<64x32xbf16, #tpu.memory_space<vmem>>, %arg3: memref<64x64xbf16, #tpu.memory_space<vmem>>, %arg4: memref<64x4xf32, #tpu.memory_space<vmem>>, %arg5: memref<1x8xf32, #tpu.memory_space<vmem>>) attributes {dimension_semantics = [#tpu.dimension_semantics<parallel>], iteration_bounds = array<i64: 1>, scalar_prefetch = 0 : i64, scratch_operands = 0 : i64, tpu.core_type = #tpu.core_type<tc>, window_params = [{transform_indices = @transform_0, window_bounds = array<i64: 8, 32>}, {pipeline_mode = #tpu.pipeline_mode<synchronous>, transform_indices = @transform_1, window_bounds = array<i64: 64, 32>}, {pipeline_mode = #tpu.pipeline_mode<synchronous>, transform_indices = @transform_2, window_bounds = array<i64: 64, 64>}, {pipeline_mode = #tpu.pipeline_mode<synchronous>, transform_indices = @transform_3, window_bounds = array<i64: 64, 4>}, {transform_indices = @transform_4, window_bounds = array<i64: 1, 8>}]} {
    %c0 = arith.constant 0 : index
    %c0_0 = arith.constant 0 : index
    %0 = vector.load %arg1[%c0, %c0_0] : memref<8x32xf32, #tpu.memory_space<vmem>>, vector<8x32xf32>
    %1 = arith.truncf %0 : vector<8x32xf32> to vector<8x32xbf16>
    %c0_1 = arith.constant 0 : index
    %c0_2 = arith.constant 0 : index
    %2 = vector.load %arg4[%c0_1, %c0_2] : memref<64x4xf32, #tpu.memory_space<vmem>>, vector<64x4xf32>
    %3 = vector.extract_strided_slice %2 {offsets = [0, 0], sizes = [64, 1], strides = [1, 1]} : vector<64x4xf32> to vector<64x1xf32>
    %4 = vector.extract_strided_slice %2 {offsets = [0, 1], sizes = [64, 1], strides = [1, 1]} : vector<64x4xf32> to vector<64x1xf32>
    %5 = vector.extract_strided_slice %2 {offsets = [0, 2], sizes = [64, 1], strides = [1, 1]} : vector<64x4xf32> to vector<64x1xf32>
    %6 = vector.extract_strided_slice %2 {offsets = [0, 3], sizes = [1, 1], strides = [1, 1]} : vector<64x4xf32> to vector<1x1xf32>
    %c0_3 = arith.constant 0 : index
    %c0_4 = arith.constant 0 : index
    %7 = vector.load %arg2[%c0_3, %c0_4] : memref<64x32xbf16, #tpu.memory_space<vmem>>, vector<64x32xbf16>
    %cst = arith.constant dense<0.000000e+00> : vector<64x8xf32>
    %8 = tpu.matmul %7, %1, %cst {dimension_numbers = #tpu.dot_dimension_numbers<[1], [1], [0], [0], [0, 0, 1, 0], [], []>} : vector<64x32xbf16>, vector<8x32xbf16>, vector<64x8xf32> -> vector<64x8xf32>
    %9 = vector.broadcast %3 : vector<64x1xf32> to vector<64x8xf32>
    %10 = arith.addf %8, %9 : vector<64x8xf32>
    %11 = arith.truncf %10 : vector<64x8xf32> to vector<64x8xbf16>
    %12 = math.tanh %11 : vector<64x8xbf16>
    %c0_5 = arith.constant 0 : index
    %c0_6 = arith.constant 0 : index
    %13 = vector.load %arg3[%c0_5, %c0_6] : memref<64x64xbf16, #tpu.memory_space<vmem>>, vector<64x64xbf16>
    %cst_7 = arith.constant dense<0.000000e+00> : vector<64x8xf32>
    %14 = tpu.matmul %13, %12, %cst_7 {dimension_numbers = #tpu.dot_dimension_numbers<[1], [0], [0], [1], [0, 0, 1, 1], [], []>} : vector<64x64xbf16>, vector<64x8xbf16>, vector<64x8xf32> -> vector<64x8xf32>
    %15 = vector.broadcast %4 : vector<64x1xf32> to vector<64x8xf32>
    %16 = arith.addf %14, %15 : vector<64x8xf32>
    %17 = arith.truncf %16 : vector<64x8xf32> to vector<64x8xbf16>
    %18 = math.tanh %17 : vector<64x8xbf16>
    %19 = arith.extf %18 : vector<64x8xbf16> to vector<64x8xf32>
    %20 = vector.broadcast %5 : vector<64x1xf32> to vector<64x8xf32>
    %21 = arith.mulf %19, %20 : vector<64x8xf32>
    %cst_8 = arith.constant dense<0.000000e+00> : vector<8xf32>
    %22 = vector.multi_reduction <add>, %21, %cst_8 [0] : vector<64x8xf32> to vector<8xf32>
    %23 = vector.shape_cast %22 : vector<8xf32> to vector<1x8xf32>
    %24 = vector.broadcast %6 : vector<1x1xf32> to vector<1x8xf32>
    %25 = arith.addf %23, %24 : vector<1x8xf32>
    %cst_9 = arith.constant 0.000000e+00 : f32
    %26 = vector.broadcast %cst_9 : f32 to vector<1x8xf32>
    %27 = arith.cmpf oge, %25, %26 : vector<1x8xf32>
    %cst_10 = arith.constant 0.00999999977 : f32
    %28 = vector.broadcast %cst_10 : f32 to vector<1x8xf32>
    %29 = arith.mulf %28, %25 : vector<1x8xf32>
    %30 = arith.select %27, %25, %29 : vector<1x8xi1>, vector<1x8xf32>
    %c0_11 = arith.constant 0 : index
    %c0_12 = arith.constant 0 : index
    %31 = vector.load %arg5[%c0_11, %c0_12] : memref<1x8xf32, #tpu.memory_space<vmem>>, vector<1x8xf32>
    tpu.vector_store %arg5[%c0_11, %c0_12], %30 {strides = array<i32>} : memref<1x8xf32, #tpu.memory_space<vmem>>, vector<1x8xf32>,
    return
  }
  func.func @transform_0(%arg0: i32) -> (i32, i32) {
    %c0_i32 = arith.constant 0 : i32
    %c0_i32_0 = arith.constant 0 : i32
    return %arg0, %c0_i32 : i32, i32
  }
  func.func @transform_1(%arg0: i32) -> (i32, i32) {
    %c0_i32 = arith.constant 0 : i32
    %c0_i32_0 = arith.constant 0 : i32
    %c0_i32_1 = arith.constant 0 : i32
    return %c0_i32, %c0_i32_0 : i32, i32
  }
  func.func @transform_2(%arg0: i32) -> (i32, i32) {
    %c0_i32 = arith.constant 0 : i32
    %c0_i32_0 = arith.constant 0 : i32
    %c0_i32_1 = arith.constant 0 : i32
    return %c0_i32, %c0_i32_0 : i32, i32
  }
  func.func @transform_3(%arg0: i32) -> (i32, i32) {
    %c0_i32 = arith.constant 0 : i32
    %c0_i32_0 = arith.constant 0 : i32
    %c0_i32_1 = arith.constant 0 : i32
    return %c0_i32, %c0_i32_0 : i32, i32
  }
  func.func @transform_4(%arg0: i32) -> (i32, i32) {
    %c0_i32 = arith.constant 0 : i32
    %c0_i32_0 = arith.constant 0 : i32
    return %c0_i32, %arg0 : i32, i32
  }
}

</mosaic_0001>

<bundles_post_ra>
// kernel: mlp_critic_forward.1
= control target key start
LH: loop header
LB: loop body
LE: loop exit
PB: predicated region body
PF: predicated region fallthrough
CT: control target
= control target key end

     0   :  { %vm96_vm0 = vcmask 261120   ;;  %v506_v1 = vmov 0   ;;  %vm245_vm1 = vcmask 523264   ;;  %v507_v17 = vmov 1   ;;  %s607_s0 = inlined_call_operand.vmem [shape: f32[2,32], index: 0, kind: input, shape index: {}]   ;;  %s608_s1 = inlined_call_operand.vmem [shape: bf16[64,32], index: 1, kind: input, shape index: {}]   ;;  %s609_s3 = inlined_call_operand.vmem [shape: f32[64,4], index: 3, kind: input, shape index: {}]   ;;  %s610_s2 = inlined_call_operand.vmem [shape: bf16[64,64], index: 2, kind: input, shape index: {}]   ;;  %s611_s4 = inlined_call_operand.vmem [shape: f32[1,8], index: 4, kind: output, shape index: {}]  }
   0x1   :  { %v18_v0 = vld [vmem:[%s607_s0] sm:$0xff]  ;;  %475 = vset.pattern.permute.xlu0 %v506_v1  ;;  %476 = vset.pattern.permute.xlu1 %v506_v1  ;;  %v22_v6 = vld [vmem:[%s609_s3 + $0x10] sm:$0xff]  ;;  %v21_v7 = vld [vmem:[%s609_s3 + $0x8] sm:$0xff]  ;;  %v508_v18 = vmov 2   ;;  %v509_v19 = vmov 3   ;;  %vm379_vm2 = vcmask 64512  }
   0x2   :  { %v19_v2 = vpack.c.bf16 %v18_v0, %v18_v0  ;;  %v482_v3 = vld [vmem:[%s608_s1] sm:$0xff]   ;;  %48 = vperm.xlu1 %476, %v22_v6   ;;  %v23_v8 = vld [vmem:[%s609_s3 + $0x18] sm:$0xff]  ;;  %v483_v9 = vld [vmem:[%s608_s1 + $0x8] sm:$0xff]   ;;  %vm409_vm3 = vcmask 57344  }
   0x3   :  { %446 = vmatprep.mubr.msk.bf16.mxu0 %vm96_vm0, %v482_v3  ;;  %v20_v5 = vld [vmem:[%s609_s3] sm:$0xff]  ;;  %v484_v10 = vld [vmem:[%s608_s1 + $0x10] sm:$0xff]   ;;  %v25_v12 = vld [vmem:[%s609_s3 + $0x28] sm:$0xff] }
   0x4   :  { %470 = vmatprep.subr.msk.bf16.mxu0 %vm96_vm0, %v19_v2  ;;  %v110_v4 = vsel %vm96_vm0, %v19_v2, 0  ;;  %38 = vperm.xlu0 %475, %v20_v5   ;;  %v24_v11 = vld [vmem:[%s609_s3 + $0x20] sm:$0xff]  ;;  %v26_v13 = vld [vmem:[%s609_s3 + $0x30] sm:$0xff]  ;;  %v27_v14 = vld [vmem:[%s609_s3 + $0x38] sm:$0xff] }
   0x5   :  { %445 = vmatpush3.bf16.xpose.msra.mxu0 %v110_v4  ;;  %v485_v15 = vld [vmem:[%s608_s1 + $0x18] sm:$0xff]   ;;  %v486_v16 = vld [vmem:[%s610_s2] sm:$0xff]   ;;  %v487_v52 = vld [vmem:[%s610_s2 + $0x8] sm:$0xff]  }
   0x6   :  { %53 = vperm.xlu1 %476, %v23_v8   ;;  %462 = vmatprep.mubr.msk.bf16.mxu1 %vm245_vm1, %v486_v16  ;;  %v488_v53 = vld [vmem:[%s610_s2 + $0x10] sm:$0xff]   ;;  %v489_v54 = vld [vmem:[%s610_s2 + $0x18] sm:$0xff]  }
   0x8   :  { %43 = vperm.xlu0 %475, %v21_v7  }
   0xa   :  { %63 = vperm.xlu1 %476, %v25_v12  }
   0xc   :  { %447 = vmatmul.mubr.msk.bf16.vlgmr.msra.gmra.mrb[0].mxu0 %vm96_vm0, %v483_v9  ;;  %58 = vperm.xlu0 %475, %v24_v11  }
   0xd   :  { %450 = vmatprep.mubr.msk.bf16.mxu0 %vm96_vm0, %v484_v10 }
   0xe   :  { %73 = vperm.xlu1 %476, %v27_v14  }
  0x10   :  { %68 = vperm.xlu0 %475, %v26_v13  }
  0x12   :  { %478 = vset.pattern.permute.xlu1 %v507_v17 }
  0x13   :  { %198 = vperm.xlu1 %478, %v21_v7  }
  0x14   :  { %451 = vmatmul.mubr.msk.bf16.gmra.mrb[4].mxu0 %vm96_vm0, %v485_v15  ;;  %477 = vset.pattern.permute.xlu0 %v507_v17 }
  0x15   :  { %194 = vperm.xlu0 %477, %v20_v5  }
  0x17   :  { %202 = vperm.xlu1 %478, %v22_v6  }
  0x19   :  { %206 = vperm.xlu0 %477, %v23_v8  }
  0x1b   :  { %210 = vperm.xlu1 %478, %v24_v11  }
  0x1d   :  { %214 = vperm.xlu0 %477, %v25_v12  }
  0x1f   :  { %218 = vperm.xlu1 %478, %v26_v13  }
  0x21   :  { %222 = vperm.xlu0 %477, %v27_v14  }
  0x23   :  { %479 = vset.pattern.permute.xlu1 %v508_v18 }
  0x24   :  { %340 = vperm.xlu1 %479, %v20_v5  }
  0x25   :  { %480 = vset.pattern.permute.xlu0 %v508_v18 }
  0x26   :  { %344 = vperm.xlu0 %480, %v21_v7  }
  0x28   :  { %348 = vperm.xlu1 %479, %v22_v6  }
  0x2a   :  { %356 = vperm.xlu0 %480, %v24_v11  }
  0x2c   :  { %352 = vperm.xlu1 %479, %v23_v8  }
  0x2e   :  { %364 = vperm.xlu0 %480, %v26_v13  }
  0x30   :  { %360 = vperm.xlu1 %479, %v25_v12  }
  0x32   :  { %481 = vset.pattern.permute.xlu0 %v509_v19 }
  0x33   :  { %402 = vperm.xlu0 %481, %v20_v5  }
  0x34   :  { %368 = vperm.xlu1 %479, %v27_v14  }
  0x81   :  { %v49_v21 = vpop.permute.xlu1 %48 }
  0x83   :  { %v39_v20 = vpop.permute.xlu0 %38 }
  0x85   :  { %v54_v23 = vpop.permute.xlu1 %53 }
  0x87   :  { %v44_v22 = vpop.permute.xlu0 %43 }
  0x89   :  { %v64_v31 = vpop.permute.xlu1 %63 }
  0x8b   :  { %v59_v27 = vpop.permute.xlu0 %58 }
  0x8d   :  { %v74_v39 = vpop.permute.xlu1 %73 }
  0x8f   :  { %v69_v37 = vpop.permute.xlu0 %68 }
  0x92   :  { %v199_v55 = vpop.permute.xlu1 %198 }
  0x94   :  { %v195_v57 = vpop.permute.xlu0 %194 }
  0x96   :  { %v203_v56 = vpop.permute.xlu1 %202 }
  0x98   :  { %v207_v59 = vpop.permute.xlu0 %206 }
  0x9a   :  { %v211_v58 = vpop.permute.xlu1 %210 }
  0x9c   :  { %v215_v3 = vpop.permute.xlu0 %214 }
  0x9e   :  { %v219_v63 = vpop.permute.xlu1 %218 }
  0xa0   :  { %v223_v11 = vpop.permute.xlu0 %222 }
  0xa3   :  { %v341_v9 = vpop.permute.xlu1 %340 }
  0xdf   :  { %v448_v24 = vpop.f32.mrb[0].mxu0 }
  0xe0   :  { %v146_v25 = vpop.f32.mrb[1].mxu0  ;;  %v155_v28 = vadd.f32 %v448_v24, %v49_v21  ;;  %v345_v24 = vpop.permute.xlu0 %344 }
  0xe1   :  { %v449_v26 = vpop.f32.mrb[2].mxu0  ;;  %v147_v32 = vadd.f32 %v146_v25, %v39_v20  ;;  %v349_v20 = vpop.permute.xlu1 %348 }
  0xe2   :  { %v158_v29 = vadd.f32 %v449_v26, %v54_v23  ;;  %v149_v30 = vpop.f32.mrb[3].mxu0 }
  0xe3   :  { %v150_v33 = vadd.f32 %v149_v30, %v44_v22 }
  0xe4   :  { %v178_v34 = vpack.c.bf16 %v158_v29, %v155_v28 }
  0xe5   :  { %v177_v35 = vpack.c.bf16 %v150_v33, %v147_v32  ;;  %v353_v28 = vpop.permute.xlu1 %352 }
  0xe7   :  { %490 = vtanh.bf16 %v177_v35  ;;  %v452_v36 = vpop.f32.mrb[4].mxu0 }
  0xe8   :  { %v162_v38 = vpop.f32.mrb[5].mxu0  ;;  %492 = vtanh.bf16 %v178_v34  ;;  %v171_v41 = vadd.f32 %v452_v36, %v69_v37  ;;  %v357_v36 = vpop.permute.xlu0 %356 }
  0xe9   :  { %v453_v40 = vpop.f32.mrb[6].mxu0  ;;  %v163_v44 = vadd.f32 %v162_v38, %v59_v27 }
  0xea   :  { %v174_v42 = vadd.f32 %v453_v40, %v74_v39  ;;  %v165_v43 = vpop.f32.mrb[7].mxu0  ;;  %v361_v40 = vpop.permute.xlu1 %360 }
  0xeb   :  { %v166_v45 = vadd.f32 %v165_v43, %v64_v31 }
  0xec   :  { %v180_v46 = vpack.c.bf16 %v174_v42, %v171_v41 }
  0xed   :  { %v179_v47 = vpack.c.bf16 %v166_v45, %v163_v44 }
  0xef   :  { %494 = vtanh.bf16 %v179_v47 }
  0xf0   :  { %496 = vtanh.bf16 %v180_v46 }
  0xf2   :  { %v491_v48 = vpop.eup %490 }
  0xf3   :  { %454 = vmatprep.subr.bf16.mxu1 %v491_v48  ;;  %v493_v49 = vpop.eup %492 }
  0xf4   :  { %455 = vmatpush3.bf16.msra.mxu1 %v491_v48 }
  0xf5   :  { %456 = vmatprep.subr.bf16.mxu1 %v493_v49 }
  0xf8   :  { %457 = vmatpush3.bf16.msra.mxu1 %v493_v49 }
  0xfa   :  { %v495_v50 = vpop.eup %494 }
  0xfb   :  { %458 = vmatprep.subr.bf16.mxu1 %v495_v50  ;;  %v497_v51 = vpop.eup %496 }
  0xfc   :  { %459 = vmatpush3.bf16.msra.mxu1 %v495_v50  ;;  %v365_v50 = vpop.permute.xlu0 %364 }
  0xfd   :  { %460 = vmatprep.subr.bf16.mxu1 %v497_v51 }
 0x100   :  { %461 = vmatpush3.bf16.msra.mxu1 %v497_v51 }
 0x103   :  { %463 = vmatmul.mubr.msk.bf16.vlgmr.msra.gmra.mrb[0].mxu1 %vm245_vm1, %v487_v52 }
 0x104   :  { %466 = vmatprep.mubr.msk.bf16.mxu1 %vm245_vm1, %v488_v53  ;;  %v369_v53 = vpop.permute.xlu1 %368 }
 0x10b   :  { %467 = vmatmul.mubr.msk.bf16.gmra.mrb[4].mxu1 %vm245_vm1, %v489_v54 }
 0x1d6   :  { %v464_v60 = vpop.f32.mrb[0].mxu1 }
 0x1d7   :  { %v292_v61 = vpop.f32.mrb[1].mxu1  ;;  %v301_v0 = vadd.f32 %v464_v60, %v203_v56 }
 0x1d8   :  { %v465_v62 = vpop.f32.mrb[2].mxu1  ;;  %v293_v4 = vadd.f32 %v292_v61, %v195_v57 }
 0x1d9   :  { %v304_v1 = vadd.f32 %v465_v62, %v207_v59  ;;  %v295_v2 = vpop.f32.mrb[3].mxu1 }
 0x1da   :  { %v296_v5 = vadd.f32 %v295_v2, %v199_v55 }
 0x1db   :  { %v324_v6 = vpack.c.bf16 %v304_v1, %v301_v0 }
 0x1dc   :  { %v323_v7 = vpack.c.bf16 %v296_v5, %v293_v4 }
 0x1dd   :  { %498 = vtanh.bf16 %v324_v6 }
 0x1de   :  { %500 = vtanh.bf16 %v323_v7  ;;  %v468_v8 = vpop.f32.mrb[4].mxu1 }
 0x1df   :  { %v308_v10 = vpop.f32.mrb[5].mxu1  ;;  %v317_v13 = vadd.f32 %v468_v8, %v219_v63 }
 0x1e0   :  { %v469_v12 = vpop.f32.mrb[6].mxu1  ;;  %v309_v16 = vadd.f32 %v308_v10, %v211_v58 }
 0x1e1   :  { %v320_v14 = vadd.f32 %v469_v12, %v223_v11  ;;  %v311_v15 = vpop.f32.mrb[7].mxu1 }
 0x1e2   :  { %v312_v17 = vadd.f32 %v311_v15, %v215_v3  ;;  %v403_v3 = vpop.permute.xlu0 %402 }
 0x1e3   :  { %v326_v18 = vpack.c.bf16 %v320_v14, %v317_v13 }
 0x1e4   :  { %v325_v19 = vpack.c.bf16 %v312_v17, %v309_v16 }
 0x1e5   :  { %502 = vtanh.bf16 %v326_v18 }
 0x1e6   :  { %504 = vtanh.bf16 %v325_v19 }
 0x1e8   :  { %v499_v21 = vpop.eup %498 }
 0x1e9   :  { %v501_v22 = vpop.eup %500  ;;  %v333_v23 = vunpack.c.l.bf16 %v499_v21  ;;  %v334_v25 = vunpack.c.h.bf16 %v499_v21 }
 0x1ea   :  { %v331_v26 = vunpack.c.l.bf16 %v501_v22  ;;  %v332_v27 = vunpack.c.h.bf16 %v501_v22 }
 0x1eb   :  { %v373_v29 = vmul.f32 %v349_v20, %v333_v23  ;;  %v374_v32 = vmul.f32 %v353_v28, %v334_v25 }
 0x1ec   :  { %v371_v30 = vmul.f32 %v341_v9, %v331_v26  ;;  %v372_v31 = vmul.f32 %v345_v24, %v332_v27 }
 0x1ed   :  { %v383_v38 = vsel %vm379_vm2, %v373_v29, 0.0  ;;  %v385_v42 = vsel %vm379_vm2, %v374_v32, 0.0 }
 0x1ee   :  { %v380_v33 = vsel %vm379_vm2, %v371_v30, 0.0  ;;  %v381_v34 = vsel %vm379_vm2, %v372_v31, 0.0 }
 0x1ef   :  { %v382_v35 = vadd.f32 %v381_v34, %v380_v33 }
 0x1f0   :  { %v503_v37 = vpop.eup %502 }
 0x1f1   :  { %v505_v39 = vpop.eup %504  ;;  %v384_v41 = vadd.f32 %v383_v38, %v382_v35  ;;  %v337_v45 = vunpack.c.l.bf16 %v503_v37  ;;  %v338_v48 = vunpack.c.h.bf16 %v503_v37 }
 0x1f2   :  { %v336_v43 = vunpack.c.h.bf16 %v505_v39  ;;  %v335_v44 = vunpack.c.l.bf16 %v505_v39 }
 0x1f3   :  { %v386_v46 = vadd.f32 %v385_v42, %v384_v41  ;;  %v377_v52 = vmul.f32 %v365_v50, %v337_v45  ;;  %v378_v56 = vmul.f32 %v369_v53, %v338_v48 }
 0x1f4   :  { %v376_v47 = vmul.f32 %v361_v40, %v336_v43  ;;  %v375_v49 = vmul.f32 %v357_v36, %v335_v44 }
 0x1f5   :  { %v391_v58 = vsel %vm379_vm2, %v377_v52, 0.0  ;;  %v393_v60 = vsel %vm379_vm2, %v378_v56, 0.0 }
 0x1f6   :  { %v387_v51 = vsel %vm379_vm2, %v375_v49, 0.0  ;;  %v389_v55 = vsel %vm379_vm2, %v376_v47, 0.0 }
 0x1f7   :  { %v388_v54 = vadd.f32 %v387_v51, %v386_v46 }
 0x1f9   :  { %v390_v57 = vadd.f32 %v389_v55, %v388_v54 }
 0x1fb   :  { %v392_v59 = vadd.f32 %v391_v58, %v390_v57 }
 0x1fd   :  { %v394_v61 = vadd.f32 %v393_v60, %v392_v59 }
 0x1ff   :  { %v395_v62 = vrot.slane %v394_v61, 4 }
 0x201   :  { %v396_v63 = vadd.f32 %v395_v62, %v394_v61 }
 0x203   :  { %v397_v0 = vrot.slane %v396_v63, 2 }
 0x205   :  { %v398_v1 = vadd.f32 %v397_v0, %v396_v63 }
 0x207   :  { %v399_v2 = vrot.slane %v398_v1, 1 }
 0x209   :  { %v400_v4 = vadd.f32 %v399_v2, %v398_v1 }
 0x20b   :  { %v405_v5 = vadd.f32 %v403_v3, %v400_v4 }
 0x20d   :  { %vm406_vm4 = vcmp.ge.f32.partialorder %v405_v5, 0.0  ;;  %v407_v6 = vmul.f32 0.01, %v405_v5 }
 0x20f   :  { %v408_v7 = vsel %vm406_vm4, %v405_v5, %v407_v6 }
 0x210   :  { %410 = vst.msk [vmem:[%s611_s4] sm:$0x1] %vm409_vm3, %v408_v7 }

</bundles_post_ra>
